<compile_context>
chip_gen: v7x
topology: tpu7x:2x2x1
jax: 0.10.0
libtpu: 0.0.40
codegen_flags: <defaults>
</compile_context>

<pallas_src>
import jax
import jax.numpy as jnp
from jax.experimental import pallas as pl
from jax.experimental.pallas import tpu as pltpu

LANE = 128      # lane width (last dim)
SUBLANE = 16    # bf16 sublane packing (second-to-last dim)


def _cdiv(a, b):
    return -(-a // b)


def _round_up(x, m):
    return _cdiv(x, m) * m


def _choose_tiling(total, unit, max_tile, min_steps=1):
    """Pick (tile, steps, padded): tile % unit == 0, tile <= max_tile,
    padded == tile * steps, padding waste < one tile. `min_steps=2` is used on
    the row axis so a 'parallel' grid feeds both v7x TensorCores when possible."""
    max_tile = max(unit, (max_tile // unit) * unit)
    padded = _round_up(max(total, 1), unit)
    units = padded // unit
    steps = max(_cdiv(padded, max_tile), min(min_steps, units))
    tile = unit * _cdiv(units, steps)
    steps = _cdiv(padded, tile)
    return tile, steps, tile * steps


def graphsage_kernel(adj_ref, feat_ref, self_ref, w_enc_ref, w_cls_ref,
                     out_ref, neigh_acc):
    """One (row-tile, V-tile) grid step of the fused GraphSage forward.

    adj_ref   : (TN, TV)     bf16  gathered, row-normalized adjacency tile
    feat_ref  : (TV, Fp)     bf16  raw node features tile
    self_ref  : (TN, Fp)     bf16  self features for this row tile
    w_enc_ref : (2*Fp, Dp)   bf16  encoder weight^T, stacked [W_self^T; W_neigh^T]
    w_cls_ref : (Dp, Cp)     bf16  classifier weight^T (lane-padded classes)
    out_ref   : (TN, Cp)     bf16  scores.t() tile
    neigh_acc : (TN, Fp)     f32   VMEM accumulator for the neighbor aggregation
    """
    k = pl.program_id(1)

    @pl.when(k == 0)
    def _():
        neigh_acc[...] = jnp.zeros_like(neigh_acc)

    # Fused mean-neighbor aggregation: neigh += adj_tile @ feat_tile (f32 acc).
    neigh_acc[...] += jnp.dot(adj_ref[...], feat_ref[...],
                              preferred_element_type=jnp.float32)

    @pl.when(k == pl.num_programs(1) - 1)
    def _():
        # Single MXU dot over stacked K = [self | neigh]  (no VPU add pass).
        combined = jnp.concatenate(
            [self_ref[...], neigh_acc[...].astype(jnp.bfloat16)], axis=1)
        embeds = jnp.dot(combined, w_enc_ref[...],
                         preferred_element_type=jnp.float32)
        embeds = jnp.maximum(embeds, 0.0)
        # scores.t() tile = embeds @ W_cls^T. bf16 inputs, f32 acc, bf16 store.
        # (Keep embeds f32 here if strict f32 parity is required — it is cheap.)
        out_ref[...] = jnp.dot(embeds.astype(jnp.bfloat16), w_cls_ref[...],
                               preferred_element_type=jnp.float32
                               ).astype(out_ref.dtype)


def make_supervised_graphsage(features, adj_norm, w_enc, w_cls, *,
                              row_tile=256, kv_tile=512):
    """One-time prep (weight transpose/pad/bf16, graph-static feature pad/cast),
    returns a jitted forward(nodes) -> (N, num_classes) f32.

    features : (V, F)  f32 raw node features
    adj_norm : (V, V)  f32 row-normalized adjacency (mean aggregation)
    w_enc    : (D, 2F) f32 encoder weight
    w_cls    : (C, D)  f32 SupervisedGraphSage.weight
    """
    v, f = features.shape
    d = w_enc.shape[0]
    c = w_cls.shape[0]
    assert w_enc.shape[1] == 2 * f and w_cls.shape[1] == d

    f_pad = _round_up(f, LANE)
    d_pad = _round_up(d, LANE)
    c_pad = _round_up(c, LANE)
    tv, kv_steps, v_pad = _choose_tiling(v, LANE, kv_tile, min_steps=1)

    bf16 = jnp.bfloat16

    def pad2(x, rows, cols):
        return jnp.pad(x, ((0, rows - x.shape[0]), (0, cols - x.shape[1])))

    # ---- one-time (init) preprocessing: never on the per-call path ----------
    feat_p = pad2(features, v_pad, f_pad).astype(bf16)                 # (Vp, Fp)
    adj_bf16 = adj_norm.astype(bf16)                                   # (V, V)
    # W_enc (D, 2F) = [W_self | W_neigh]; transpose, pad each half, stack on K.
    w_enc_t = jnp.concatenate(
        [pad2(w_enc[:, :f].T, f_pad, d_pad),
         pad2(w_enc[:, f:].T, f_pad, d_pad)], axis=0).astype(bf16)     # (2Fp, Dp)
    w_cls_t = pad2(w_cls.T, d_pad, c_pad).astype(bf16)                 # (Dp, Cp)

    @jax.jit
    def forward(nodes):
        n = nodes.shape[0]
        tn, n_steps, n_pad = _choose_tiling(n, SUBLANE, row_tile, min_steps=2)

        # Gather + bf16 + pad fuse under jit into single HBM passes.
        adj_rows = adj_bf16[nodes]                                     # (N, V)
        adj_p = jnp.pad(adj_rows, ((0, n_pad - n), (0, v_pad - v)))
        self_p = jnp.pad(feat_p[nodes], ((0, n_pad - n), (0, 0)))      # (Np, Fp)

        out = pl.pallas_call(
            graphsage_kernel,
            out_shape=jax.ShapeDtypeStruct((n_pad, c_pad), bf16),
            grid=(n_steps, kv_steps),
            in_specs=[
                pl.BlockSpec((tn, tv), lambda i, k: (i, k)),           # adj rows
                pl.BlockSpec((tv, f_pad), lambda i, k: (k, 0)),        # features
                pl.BlockSpec((tn, f_pad), lambda i, k: (i, 0)),        # self feats
                pl.BlockSpec((2 * f_pad, d_pad), lambda i, k: (0, 0),
                             pipeline_mode=pl.Buffered(1)),            # W_enc^T
                pl.BlockSpec((d_pad, c_pad), lambda i, k: (0, 0),
                             pipeline_mode=pl.Buffered(1)),            # W_cls^T
            ],
            out_specs=pl.BlockSpec((tn, c_pad), lambda i, k: (i, 0)),
            scratch_shapes=[pltpu.VMEM((tn, f_pad), jnp.float32)],     # neigh acc
            compiler_params=pltpu.CompilerParams(
                dimension_semantics=("parallel", "arbitrary"),
                vmem_limit_bytes=48 * 1024 * 1024,   # fits v7x's 64 MiB / TC
            ),
        )(adj_p, feat_p, self_p, w_enc_t, w_cls_t)

        return out[:n, :c].astype(jnp.float32)

    return forward


def xavier_uniform(key, shape):
    """torch.nn.init.xavier_uniform for a 2D (fan_out, fan_in) weight."""
    fan_out, fan_in = shape
    bound = jnp.sqrt(6.0 / (fan_in + fan_out))
    return jax.random.uniform(key, shape, jnp.float32, minval=-bound, maxval=bound)


if __name__ == "__main__":
    key = jax.random.PRNGKey(0)
    k_feat, k_adj, k_enc, k_cls = jax.random.split(key, 4)

    # Small synthetic graph / encoder configuration (multi-tile on both axes:
    # 2 row tiles of 16 and 2 V tiles of 128 with kv_tile=128).
    num_total_nodes = 200   # nodes in the graph (V)
    feat_dim = 16           # raw node feature dim (F)
    num_nodes = 24          # nodes passed to forward() (N)
    embed_dim = 32          # enc.embed_dim (D)
    num_classes = 4         # C

    features = jax.random.normal(k_feat, (num_total_nodes, feat_dim), jnp.float32)

    # Row-normalized adjacency (mean neighbor aggregation), deterministic.
    adj_logits = jax.random.uniform(k_adj, (num_total_nodes, num_total_nodes))
    adj = (adj_logits > 0.9).astype(jnp.float32)
    adj = adj + jnp.eye(num_total_nodes, dtype=jnp.float32)  # nonzero degree
    adj_norm = adj / jnp.sum(adj, axis=1, keepdims=True)

    nodes = jnp.arange(num_nodes, dtype=jnp.int32)

    # Synthetic encoder weight (D, 2F) and the module's classifier weight
    # (num_classes, embed_dim), xavier_uniform as in __init__.
    w_enc = xavier_uniform(k_enc, (embed_dim, 2 * feat_dim))
    w_cls = xavier_uniform(k_cls, (num_classes, embed_dim))

    forward = make_supervised_graphsage(features, adj_norm, w_enc, w_cls,
                                        row_tile=256, kv_tile=128)
    scores_t = jax.block_until_ready(forward(nodes))

    # Pure-JAX reference of the same math, mirroring the kernel's bf16
    # quantization of MXU inputs (accumulation stays f32) and bf16 output.
    bf = lambda x: x.astype(jnp.bfloat16).astype(jnp.float32)
    self_q = bf(features[nodes])                                     # (N, F)
    neigh = bf(adj_norm[nodes]) @ bf(features)                       # (N, F) f32 acc
    combined = jnp.concatenate([self_q, bf(neigh)], axis=1)          # (N, 2F)
    embeds = jnp.maximum(combined @ bf(w_enc).T, 0.0)                # (N, D)
    ref = bf(bf(embeds) @ bf(w_cls).T)                               # (N, C)

    assert scores_t.shape == (num_nodes, num_classes)
    max_err = jnp.max(jnp.abs(scores_t - ref))
    assert jnp.allclose(scores_t, ref, atol=3e-2, rtol=3e-2), max_err

    print("KERNEL_OK")
</pallas_src>

<mosaic_0001>
module attributes {stable_mosaic.version = 11 : i64} {
  func.func @graphsage_kernel(%arg0: i32, %arg1: i32, %arg2: memref<16x128xbf16, #tpu.memory_space<vmem>>, %arg3: memref<128x128xbf16, #tpu.memory_space<vmem>>, %arg4: memref<16x128xbf16, #tpu.memory_space<vmem>>, %arg5: memref<256x128xbf16, #tpu.memory_space<vmem>>, %arg6: memref<128x128xbf16, #tpu.memory_space<vmem>>, %arg7: memref<16x128xbf16, #tpu.memory_space<vmem>>, %arg8: memref<16x128xf32, #tpu.memory_space<vmem>>) attributes {dimension_semantics = [#tpu.dimension_semantics<parallel>, #tpu.dimension_semantics<arbitrary>], iteration_bounds = array<i64: 2, 2>, scalar_prefetch = 0 : i64, scratch_operands = 1 : i64, tpu.core_type = #tpu.core_type<tc>, window_params = [{transform_indices = @transform_0, window_bounds = array<i64: 16, 128>}, {transform_indices = @transform_1, window_bounds = array<i64: 128, 128>}, {transform_indices = @transform_2, window_bounds = array<i64: 16, 128>}, {pipeline_mode = #tpu.pipeline_mode<synchronous>, transform_indices = @transform_3, window_bounds = array<i64: 256, 128>}, {pipeline_mode = #tpu.pipeline_mode<synchronous>, transform_indices = @transform_4, window_bounds = array<i64: 128, 128>}, {transform_indices = @transform_5, window_bounds = array<i64: 16, 128>}]} {
    %c0_i32 = arith.constant 0 : i32
    %0 = arith.cmpi eq, %arg1, %c0_i32 : i32
    %1 = arith.extui %0 : i1 to i32
    %c0_i32_0 = arith.constant 0 : i32
    %2 = arith.cmpi ne, %1, %c0_i32_0 : i32
    scf.if %2 {
      %cst_9 = arith.constant 0.000000e+00 : f32
      %12 = vector.broadcast %cst_9 : f32 to vector<16x128xf32>
      %c0_10 = arith.constant 0 : index
      %c0_11 = arith.constant 0 : index
      %13 = vector.load %arg8[%c0_10, %c0_11] : memref<16x128xf32, #tpu.memory_space<vmem>>, vector<16x128xf32>
      tpu.vector_store %arg8[%c0_10, %c0_11], %12 {strides = array<i32>} : memref<16x128xf32, #tpu.memory_space<vmem>>, vector<16x128xf32>,
    } else {
    }
    %c0 = arith.constant 0 : index
    %c0_1 = arith.constant 0 : index
    %3 = vector.load %arg8[%c0, %c0_1] : memref<16x128xf32, #tpu.memory_space<vmem>>, vector<16x128xf32>
    %c0_2 = arith.constant 0 : index
    %c0_3 = arith.constant 0 : index
    %4 = vector.load %arg2[%c0_2, %c0_3] : memref<16x128xbf16, #tpu.memory_space<vmem>>, vector<16x128xbf16>
    %c0_4 = arith.constant 0 : index
    %c0_5 = arith.constant 0 : index
    %5 = vector.load %arg3[%c0_4, %c0_5] : memref<128x128xbf16, #tpu.memory_space<vmem>>, vector<128x128xbf16>
    %cst = arith.constant dense<0.000000e+00> : vector<16x128xf32>
    %6 = tpu.matmul %4, %5, %cst {dimension_numbers = #tpu.dot_dimension_numbers<[1], [0], [0], [1], [0, 0, 1, 1], [], []>} : vector<16x128xbf16>, vector<128x128xbf16>, vector<16x128xf32> -> vector<16x128xf32>
    %7 = arith.addf %3, %6 : vector<16x128xf32>
    %c0_6 = arith.constant 0 : index
    %c0_7 = arith.constant 0 : index
    %8 = vector.load %arg8[%c0_6, %c0_7] : memref<16x128xf32, #tpu.memory_space<vmem>>, vector<16x128xf32>
    tpu.vector_store %arg8[%c0_6, %c0_7], %7 {strides = array<i32>} : memref<16x128xf32, #tpu.memory_space<vmem>>, vector<16x128xf32>,
    %c1_i32 = arith.constant 1 : i32
    %9 = arith.cmpi eq, %arg1, %c1_i32 : i32
    %10 = arith.extui %9 : i1 to i32
    %c0_i32_8 = arith.constant 0 : i32
    %11 = arith.cmpi ne, %10, %c0_i32_8 : i32
    scf.if %11 {
      %c0_9 = arith.constant 0 : index
      %c0_10 = arith.constant 0 : index
      %12 = vector.load %arg4[%c0_9, %c0_10] : memref<16x128xbf16, #tpu.memory_space<vmem>>, vector<16x128xbf16>
      %c0_11 = arith.constant 0 : index
      %c0_12 = arith.constant 0 : index
      %13 = vector.load %arg8[%c0_11, %c0_12] : memref<16x128xf32, #tpu.memory_space<vmem>>, vector<16x128xf32>
      %14 = arith.truncf %13 : vector<16x128xf32> to vector<16x128xbf16>
      %15 = tpu.concatenate %12, %14 in 1 : vector<16x128xbf16>, vector<16x128xbf16> -> vector<16x256xbf16>
      %c0_13 = arith.constant 0 : index
      %c0_14 = arith.constant 0 : index
      %16 = vector.load %arg5[%c0_13, %c0_14] : memref<256x128xbf16, #tpu.memory_space<vmem>>, vector<256x128xbf16>
      %cst_15 = arith.constant dense<0.000000e+00> : vector<16x128xf32>
      %17 = tpu.matmul %15, %16, %cst_15 {dimension_numbers = #tpu.dot_dimension_numbers<[1], [0], [0], [1], [0, 0, 1, 1], [], []>} : vector<16x256xbf16>, vector<256x128xbf16>, vector<16x128xf32> -> vector<16x128xf32>
      %cst_16 = arith.constant 0.000000e+00 : f32
      %18 = vector.broadcast %cst_16 : f32 to vector<16x128xf32>
      %19 = arith.maximumf %17, %18 : vector<16x128xf32>
      %20 = arith.truncf %19 : vector<16x128xf32> to vector<16x128xbf16>
      %c0_17 = arith.constant 0 : index
      %c0_18 = arith.constant 0 : index
      %21 = vector.load %arg6[%c0_17, %c0_18] : memref<128x128xbf16, #tpu.memory_space<vmem>>, vector<128x128xbf16>
      %cst_19 = arith.constant dense<0.000000e+00> : vector<16x128xf32>
      %22 = tpu.matmul %20, %21, %cst_19 {dimension_numbers = #tpu.dot_dimension_numbers<[1], [0], [0], [1], [0, 0, 1, 1], [], []>} : vector<16x128xbf16>, vector<128x128xbf16>, vector<16x128xf32> -> vector<16x128xf32>
      %23 = arith.truncf %22 : vector<16x128xf32> to vector<16x128xbf16>
      %c0_20 = arith.constant 0 : index
      %c0_21 = arith.constant 0 : index
      %24 = vector.load %arg7[%c0_20, %c0_21] : memref<16x128xbf16, #tpu.memory_space<vmem>>, vector<16x128xbf16>
      tpu.vector_store %arg7[%c0_20, %c0_21], %23 {strides = array<i32>} : memref<16x128xbf16, #tpu.memory_space<vmem>>, vector<16x128xbf16>,
    } else {
    }
    return
  }
  func.func @transform_0(%arg0: i32, %arg1: i32) -> (i32, i32) {
    %c0_i32 = arith.constant 0 : i32
    return %arg0, %arg1 : i32, i32
  }
  func.func @transform_1(%arg0: i32, %arg1: i32) -> (i32, i32) {
    %c0_i32 = arith.constant 0 : i32
    %c0_i32_0 = arith.constant 0 : i32
    return %arg1, %c0_i32 : i32, i32
  }
  func.func @transform_2(%arg0: i32, %arg1: i32) -> (i32, i32) {
    %c0_i32 = arith.constant 0 : i32
    %c0_i32_0 = arith.constant 0 : i32
    return %arg0, %c0_i32 : i32, i32
  }
  func.func @transform_3(%arg0: i32, %arg1: i32) -> (i32, i32) {
    %c0_i32 = arith.constant 0 : i32
    %c0_i32_0 = arith.constant 0 : i32
    %c0_i32_1 = arith.constant 0 : i32
    return %c0_i32, %c0_i32_0 : i32, i32
  }
  func.func @transform_4(%arg0: i32, %arg1: i32) -> (i32, i32) {
    %c0_i32 = arith.constant 0 : i32
    %c0_i32_0 = arith.constant 0 : i32
    %c0_i32_1 = arith.constant 0 : i32
    return %c0_i32, %c0_i32_0 : i32, i32
  }
  func.func @transform_5(%arg0: i32, %arg1: i32) -> (i32, i32) {
    %c0_i32 = arith.constant 0 : i32
    %c0_i32_0 = arith.constant 0 : i32
    return %arg0, %c0_i32 : i32, i32
  }
}

</mosaic_0001>

<bundles_post_ra>
// kernel: forward.1
= control target key start
LH: loop header
LB: loop body
LE: loop exit
PB: predicated region body
PF: predicated region fallthrough
CT: control target
= control target key end

     0   :  { %s1191_s18 = smov 0   ;;  %s1193_s19 = smov 0   ;;  %s1381_s0 = inlined_call_operand.vmem [shape: bf16[32,256], index: 0, kind: input, shape index: {}]   ;;  %s1382_s1 = inlined_call_operand.vmem [shape: bf16[256,128], index: 1, kind: input, shape index: {}]   ;;  %s1383_s2 = inlined_call_operand.vmem [shape: bf16[32,128], index: 2, kind: input, shape index: {}]   ;;  %s1384_s3 = inlined_call_operand.vmem [shape: bf16[256,128], index: 3, kind: input, shape index: {}]   ;;  %s1385_s4 = inlined_call_operand.vmem [shape: bf16[128,128], index: 4, kind: input, shape index: {}]   ;;  %s1386_s5 = inlined_call_operand.vmem [shape: bf16[32,128], index: 5, kind: output, shape index: {}]  }
   0x1   :  { %s1195_s20 = smov 0   ;;  %s1197_s21 = smov 0  }
   0x2   :  { %s1199_s22 = smov 0   ;;  %s1201_s23 = smov 0  }
   0x3   :  { %s1203_s24 = smov 0  }
   0x4 LB: > { %s24_s25 = sadd.s32 1, %s1146_s22  ;;  %s27_s26 = sadd.s32 1, %s1150_s23  ;;  %s1154_s24 = sphi %s1203_s24, %s15_s24   ;;  %s1150_s23 = sphi %s1201_s23, %s1392_s23   ;;  %s1146_s22 = sphi %s1199_s22, %s1391_s22   ;;  %s1142_s21 = sphi %s1197_s21, %s1390_s21   ;;  %s1138_s20 = sphi %s1195_s20, %s1389_s20   ;;  %s1134_s19 = sphi %s1193_s19, %s1388_s19   ;;  %s1130_s18 = sphi %s1191_s18, %s1387_s18  }
   0x5   : > { %p25_p0 = scmp.ge.s32.totalorder %s24_s25, 2  ;;  %p43_p1 = scmp.ne.s32.totalorder %s1134_s19, %s1130_s18 }
   0x6   : > { %p44_p2 = scmp.eq.s32.totalorder %s1154_s24, 0  ;;  %s36_s30 = sadd.s32 1, %s1134_s19 }
   0x7   : > { %s1394_s25 = smov (%p25_p0, %s24_s25), 0  ;;  %s1396_s26 = smov (!%p25_p0, %s27_s26), %s1150_s23 }
   0x8   : > { %p45_p3 = por %p44_p2, %p43_p1  ;;  %p29_p4 = scmp.ge.s32.totalorder %s1396_s26, 2 }
   0x9   : > { %s32_s27 = ssub.s32 %s1146_s22, %s1394_s25  ;;  %p864_p6 = scmp.ge.s32.totalorder %s1154_s24, 4 }
   0xa   : > { %s1398_s26 = smov (%p29_p4, %s1396_s26), 0 }
   0xb   : > { %s31_s28 = ssub.s32 %s1150_s23, %s1398_s26  ;;  %195 = sbr.rel (%p864_p6) target bundleno = 25 (0x19), region = 24 }
   0xc   : > { %s33_s29 = sor.u32 %s32_s27, %s31_s28 }
   0xd   : > { %p34_p5 = scmp.eq.s32.totalorder %s33_s29, 0 }
   0xf   : > { %s1242_s6 = scalar_select %p34_p5, %s1134_s19, %s36_s30  }
  0x12   : > { %198 = sbr.rel (!%p45_p3) target bundleno = 25 (0x19), region = 28  ;;  %s200_s7 = sand.u32 (%p45_p3), 1, %s1134_s19  }
  0x13   : > { %s917_s8 = sshll.u32 (%p45_p3), %s1150_s23, 2  ;;  %s865_s9 = sshll.u32 (%p45_p3), %s200_s7, 3 }
  0x14   : > { %s205_s10 = sadd.s32 (%p45_p3), %s1146_s22, %s917_s8  ;;  %s202_s15 = scalar_lea.vmem (%p45_p3), [#allocation3], %s865_s9 }
  0x15   : > { %s868_s11 = sshll.u32 (%p45_p3), %s205_s10, 2 }
  0x16   : > { %s207_s14 = scalar_lea.vmem (%p45_p3), %s1381_s0, %s868_s11 }
  0x17   : > { %v223_v0 = vld [vmem:[%s207_s14] sm:$0xf] (%p45_p3)  ;;  %v225_v1 = vld [vmem:[%s207_s14 + $0x8] sm:$0xf] (%p45_p3) }
  0x18   : > { %224 = vst [vmem:[%s202_s15] sm:$0xf] (%p45_p3), %v223_v0  ;;  %226 = vst [vmem:[%s202_s15 + $0x4] sm:$0xf] (%p45_p3), %v225_v1 }
  0x19 PF: > { %p869_p7 = scmp.ge.s32.totalorder %s1154_s24, 1  ;;  %p270_p8 = scmp.lt.s32.totalorder %s1154_s24, 5 }
  0x1b   : > { %p271_p9 = pnand %p869_p7, %p270_p8 }
  0x1c   : > { %s277_s16 = sand.u32 (!%p271_p9), 1, %s1130_s18   ;;  %s871_s17 = sshll.u32 (!%p271_p9), %s1138_s20, 4 }
  0x1d   : > { %274 = sbr.rel (%p271_p9) target bundleno = 744 (0x2e8), region = 77  ;;  %s1255_s27 = sshll.u32 (!%p271_p9), %s277_s16, 3 }
  0x1e   : > { %p316_p10 = scmp.lt.s32.totalorder (!%p271_p9), %s871_s17, 31  ;;  %s873_s28 = sshll.u32 (!%p271_p9), %s1142_s21, 1 }
  0x1f   : > { %p322_p11 = scmp.lt.s32.totalorder (!%p271_p9), %s873_s28, 3  ;;  %s279_s21 = scalar_lea.vmem (!%p271_p9), [#allocation3], %s1255_s27 }
  0x20   : > { %p877_p12 = scmp.ne.s32.totalorder (!%p271_p9), %s1138_s20, 0 }
  0x24   : > { %s1400_s17 = smov (!%p316_p10, %s871_s17), 31  ;;  %s1402_s28 = smov (!%p322_p11, %s873_s28), 3 }
  0x25   : > { %s872_s29 = sshll.u32 %s1400_s17, 2  ;;  %s874_s9 = sshll.u32 %s1402_s28, 2  ;;  %v1156_v2 = vmov (!%p877_p12), 0.0  }
  0x26   : > { %s1261_s8 = scalar_lea.vmem %s1382_s1, %s872_s29  ;;  %s1266_s18 = scalar_lea.vmem %s1383_s2, %s874_s9  ;;  %338 = vst [vmem:[#allocation2] sm:$0xff] (!%p877_p12), %v1156_v2  ;;  %339 = vst [vmem:[#allocation2 + $0x8] sm:$0xff] (!%p877_p12), %v1156_v2 }
  0x27   : > { %s1271_s14 = scalar_lea.vmem %s1386_s5, %s874_s9  ;;  %337 = sbr.rel (%p877_p12) target bundleno = 46 (0x2e), region = 85 }
  0x2e PF: > { %v1066_v3 = vld [vmem:[%s1261_s8] sm:$0xff]   ;;  %v1157_v4 = vmov 0.0   ;;  %v1067_v5 = vld [vmem:[%s1261_s8 + $0x8] sm:$0xff]   ;;  %vm1158_vm0 = vmmov 0   ;;  %v1068_v6 = vld [vmem:[%s1261_s8 + $0x10] sm:$0xff]   ;;  %p887_p13 = scmp.ne.s32.totalorder %s1138_s20, 1 }
  0x2f   : > { %965 = vmatprep.subr.bf16.mxu0 %v1157_v4  ;;  %981 = vmatprep.mubr.msk.bf16.mxu0 %vm1158_vm0, %v1157_v4  ;;  %v1069_v7 = vld [vmem:[%s1261_s8 + $0x18] sm:$0xff]   ;;  %v1070_v8 = vld [vmem:[%s1261_s8 + $0x20] sm:$0xff]   ;;  %v1071_v9 = vld [vmem:[%s1261_s8 + $0x28] sm:$0xff]   ;;  %v1159_v23 = vmov (!%p887_p13), 0.0   ;;  %vm1160_vm1 = vmmov (!%p887_p13), 0  }
  0x30   : > { %966 = vmatpush3.bf16.msra.mxu0 %v1066_v3  ;;  %v1072_v10 = vld [vmem:[%s1261_s8 + $0x30] sm:$0xff]   ;;  %v1073_v11 = vld [vmem:[%s1261_s8 + $0x38] sm:$0xff]   ;;  %v340_v13 = vld [vmem:[#allocation2] sm:$0xff]  ;;  %985 = vmatprep.subr.bf16.mxu1 (!%p887_p13), %v1159_v23 }
  0x31   : > { %967 = vmatprep.subr.bf16.mxu0 %v1157_v4  ;;  %v1074_v12 = vld [vmem:[%s279_s21] sm:$0xff]   ;;  %v341_v15 = vld [vmem:[#allocation2 + $0x8] sm:$0xff]  ;;  %v1075_v21 = vld [vmem:[%s1384_s3 + $0x40] sm:$0xff] (!%p887_p13)   ;;  %1001 = vmatprep.mubr.msk.bf16.mxu1 (!%p887_p13), %vm1160_vm1, %v1159_v23 }
  0x32   : > { %v1076_v22 = vld [vmem:[%s1384_s3] sm:$0xff] (!%p887_p13)   ;;  %v1077_v24 = vld [vmem:[%s1384_s3 + $0x48] sm:$0xff] (!%p887_p13)   ;;  %v1079_v26 = vld [vmem:[%s1384_s3 + $0x50] sm:$0xff] (!%p887_p13)  }
  0x33   : > { %v1078_v25 = vld [vmem:[%s1384_s3 + $0x8] sm:$0xff] (!%p887_p13)   ;;  %v1080_v27 = vld [vmem:[%s1384_s3 + $0x10] sm:$0xff] (!%p887_p13)   ;;  %v1081_v28 = vld [vmem:[%s1384_s3 + $0x58] sm:$0xff] (!%p887_p13)  }
  0x34   : > { %968 = vmatpush3.bf16.msra.mxu0 %v1067_v5  ;;  %v1082_v29 = vld [vmem:[%s1384_s3 + $0x18] sm:$0xff] (!%p887_p13)   ;;  %v1083_v30 = vld [vmem:[%s1384_s3 + $0x60] sm:$0xff] (!%p887_p13)   ;;  %v1085_v32 = vld [vmem:[%s1384_s3 + $0x68] sm:$0xff] (!%p887_p13)  }
  0x35   : > { %969 = vmatprep.subr.bf16.mxu0 %v1157_v4  ;;  %v1084_v31 = vld [vmem:[%s1384_s3 + $0x20] sm:$0xff] (!%p887_p13)   ;;  %v1086_v35 = vld [vmem:[%s1384_s3 + $0x28] sm:$0xff] (!%p887_p13)   ;;  %v1087_v38 = vld [vmem:[%s1384_s3 + $0x70] sm:$0xff] (!%p887_p13)  }
  0x36   : > { %v1092_v37 = vld [vmem:[%s1385_s4] sm:$0xff] (!%p887_p13)   ;;  %v1093_v39 = vld [vmem:[%s1385_s4 + $0x8] sm:$0xff] (!%p887_p13)   ;;  %v1088_v40 = vld [vmem:[%s1384_s3 + $0x30] sm:$0xff] (!%p887_p13)  }
  0x37   : > { %986 = vmatpush3.bf16.msra.mxu1 (!%p887_p13), %v1092_v37  ;;  %v1089_v41 = vld [vmem:[%s1384_s3 + $0x78] sm:$0xff] (!%p887_p13)   ;;  %v1094_v42 = vld [vmem:[%s1385_s4 + $0x10] sm:$0xff] (!%p887_p13)   ;;  %v1091_v45 = vld [vmem:[%s1266_s18] sm:$0xff] (!%p887_p13)  }
  0x38   : > { %970 = vmatpush3.bf16.msra.mxu0 %v1068_v6  ;;  %987 = vmatprep.subr.bf16.mxu1 (!%p887_p13), %v1159_v23  ;;  %v1090_v43 = vld [vmem:[%s1384_s3 + $0x38] sm:$0xff] (!%p887_p13)   ;;  %v1096_v46 = vld [vmem:[%s1385_s4 + $0x20] sm:$0xff] (!%p887_p13)   ;;  %v1097_v47 = vld [vmem:[%s1385_s4 + $0x28] sm:$0xff] (!%p887_p13)  }
  0x39   : > { %971 = vmatprep.subr.bf16.mxu0 %v1157_v4  ;;  %v1095_v44 = vld [vmem:[%s1385_s4 + $0x18] sm:$0xff] (!%p887_p13)   ;;  %v1098_v48 = vld [vmem:[%s1385_s4 + $0x30] sm:$0xff] (!%p887_p13)  }
  0x3a   : > { %v1099_v49 = vld [vmem:[%s1385_s4 + $0x38] sm:$0xff] (!%p887_p13)  }
  0x3b   : > { %988 = vmatpush3.bf16.msra.mxu1 (!%p887_p13), %v1093_v39 }
  0x3c   : > { %972 = vmatpush3.bf16.msra.mxu0 %v1069_v7  ;;  %989 = vmatprep.subr.bf16.mxu1 (!%p887_p13), %v1159_v23 }
  0x3d   : > { %973 = vmatprep.subr.bf16.mxu0 %v1157_v4 }
  0x3f   : > { %990 = vmatpush3.bf16.msra.mxu1 (!%p887_p13), %v1094_v42 }
  0x40   : > { %974 = vmatpush3.bf16.msra.mxu0 %v1070_v8  ;;  %991 = vmatprep.subr.bf16.mxu1 (!%p887_p13), %v1159_v23 }
  0x41   : > { %975 = vmatprep.subr.bf16.mxu0 %v1157_v4 }
  0x43   : > { %992 = vmatpush3.bf16.msra.mxu1 (!%p887_p13), %v1095_v44 }
  0x44   : > { %976 = vmatpush3.bf16.msra.mxu0 %v1071_v9  ;;  %993 = vmatprep.subr.bf16.mxu1 (!%p887_p13), %v1159_v23 }
  0x45   : > { %977 = vmatprep.subr.bf16.mxu0 %v1157_v4 }
  0x47   : > { %994 = vmatpush3.bf16.msra.mxu1 (!%p887_p13), %v1096_v46 }
  0x48   : > { %978 = vmatpush3.bf16.msra.mxu0 %v1072_v10  ;;  %995 = vmatprep.subr.bf16.mxu1 (!%p887_p13), %v1159_v23 }
  0x49   : > { %979 = vmatprep.subr.bf16.mxu0 %v1157_v4 }
  0x4b   : > { %996 = vmatpush3.bf16.msra.mxu1 (!%p887_p13), %v1097_v47 }
  0x4c   : > { %980 = vmatpush3.bf16.msra.mxu0 %v1073_v11  ;;  %997 = vmatprep.subr.bf16.mxu1 (!%p887_p13), %v1159_v23 }
  0x4d   : > { %934 = vmatprep.subr.bf16.mxu0 (!%p887_p13), %v1075_v21 }
  0x4f   : > { %982 = vmatmul.mubr.bf16.vlgmr.msra.gmra.mrb[0].mxu0 %v1074_v12  ;;  %998 = vmatpush3.bf16.msra.mxu1 (!%p887_p13), %v1098_v48 }
  0x50   : > { %935 = vmatpush3.bf16.msra.mxu0 (!%p887_p13), %v1076_v22  ;;  %999 = vmatprep.subr.bf16.mxu1 (!%p887_p13), %v1159_v23 }
  0x51   : > { %936 = vmatprep.subr.bf16.mxu0 (!%p887_p13), %v1077_v24 }
  0x53   : > { %1000 = vmatpush3.bf16.msra.mxu1 (!%p887_p13), %v1099_v49 }
  0x54   : > { %937 = vmatpush3.bf16.msra.mxu0 (!%p887_p13), %v1078_v25 }
  0x55   : > { %938 = vmatprep.subr.bf16.mxu0 (!%p887_p13), %v1079_v26 }
  0x58   : > { %939 = vmatpush3.bf16.msra.mxu0 (!%p887_p13), %v1080_v27 }
  0x59   : > { %940 = vmatprep.subr.bf16.mxu0 (!%p887_p13), %v1081_v28 }
  0x5c   : > { %941 = vmatpush3.bf16.msra.mxu0 (!%p887_p13), %v1082_v29 }
  0x5d   : > { %942 = vmatprep.subr.bf16.mxu0 (!%p887_p13), %v1083_v30 }
  0x60   : > { %943 = vmatpush3.bf16.msra.mxu0 (!%p887_p13), %v1084_v31 }
  0x61   : > { %944 = vmatprep.subr.bf16.mxu0 (!%p887_p13), %v1085_v32 }
  0x64   : > { %945 = vmatpush3.bf16.msra.mxu0 (!%p887_p13), %v1086_v35 }
  0x65   : > { %946 = vmatprep.subr.bf16.mxu0 (!%p887_p13), %v1087_v38 }
  0x68   : > { %947 = vmatpush3.bf16.msra.mxu0 (!%p887_p13), %v1088_v40 }
  0x69   : > { %948 = vmatprep.subr.bf16.mxu0 (!%p887_p13), %v1089_v41 }
  0x6c   : > { %949 = vmatpush3.bf16.msra.mxu0 (!%p887_p13), %v1090_v43 }
 0x121   : > { %462 = sbr.rel (%p887_p13) target bundleno = 744 (0x2e8), region = 89 }
 0x122   : > { %v448_v14 = vpop.f32.mrb[0].mxu0 }
 0x123   : > { %v455_v16 = vadd.f32 %v448_v14, %v340_v13  ;;  %v983_v17 = vpop.f32.mrb[1].mxu0 }
 0x124   : > { %v451_v18 = vpop.f32.mrb[2].mxu0 }
 0x125   : > { %457 = vst [vmem:[#allocation2] sm:$0xff] %v455_v16  ;;  %v456_v19 = vadd.f32 %v451_v18, %v341_v15  ;;  %v984_v20 = vpop.f32.mrb[3].mxu0 }
 0x127   : > { %458 = vst [vmem:[#allocation2 + $0x8] sm:$0xff] %v456_v19 }
 0x12c   : > { %v465_v33 = vld [vmem:[#allocation2] sm:$0xff] }
 0x12e   : > { %v466_v34 = vld [vmem:[#allocation2 + $0x8] sm:$0xff] }
 0x12f   : > { %v467_v36 = vpack.c.bf16 %v466_v34, %v465_v33 }
 0x131   : > { %634 = vmatprep.mubr.bf16.mxu0 %v467_v36 }
 0x132   : > { %635 = vmatmul.mubr.bf16.vlgmr.msra.gmra.mrb[0].mxu0 %v1091_v45 }
 0x205   : > { %v950_v50 = vpop.f32.mrb[0].mxu0 }
 0x206   : > { %v951_v51 = vpop.f32.mrb[1].mxu0 }
 0x207   : > { %v952_v52 = vadd.f32 %v951_v51, %v950_v50  ;;  %v953_v53 = vpop.f32.mrb[2].mxu0 }
 0x208   : > { %v954_v54 = vpop.f32.mrb[3].mxu0 }
 0x209   : > { %v955_v55 = vadd.f32 %v954_v54, %v953_v53  ;;  %v643_v56 = vmax.f32 %v952_v52, 0.0 }
 0x20b   : > { %v644_v57 = vmax.f32 %v955_v55, 0.0 }
 0x20d   : > { %v645_v58 = vpack.c.bf16 %v644_v57, %v643_v56 }
 0x20f   : > { %1002 = vmatmul.mubr.bf16.vlgmr.msra.gmra.mrb[0].mxu1 %v645_v58 }
 0x2e2   : > { %v744_v59 = vpop.f32.mrb[0].mxu1 }
 0x2e3   : > { %v1003_v60 = vpop.f32.mrb[1].mxu1 }
 0x2e4   : > { %v747_v61 = vpop.f32.mrb[2].mxu1 }
 0x2e5   : > { %v923_v62 = vpack.c.bf16 %v747_v61, %v744_v59  ;;  %v1004_v63 = vpop.f32.mrb[3].mxu1 }
 0x2e7   : > { %924 = vst [vmem:[%s1271_s14] sm:$0xff] %v923_v62  }
 0x2e8 PF: > { %s15_s24 = sadd.s32 1, %s1154_s24   ;;  %s1387_s18 = smov %s1134_s19 }
 0x2e9   : > { %p12_p0 = scmp.ge.s32.totalorder %s15_s24, 6   ;;  %s1388_s19 = smov %s1242_s6 }
 0x2ea   : > { %s1389_s20 = smov %s1146_s22  ;;  %s1390_s21 = smov %s1150_s23 }
 0x2eb   : > { %s1391_s22 = smov %s1394_s25  ;;  %s1392_s23 = smov %s1398_s26 }
 0x2ec   :  { %14 = sbr.rel (!%p12_p0) target bundleno = 4 (0x4), region = 130 }

</bundles_post_ra>
